<compile_context>
chip_gen: v6e
topology: v6e:2x2x1
jax: 0.10.0
libtpu: 0.0.40
codegen_flags: <defaults>
</compile_context>

<pallas_src>
import jax
import jax.numpy as jnp
from jax.experimental import pallas as pl
from jax.experimental.pallas import tpu as pltpu


def _mlp_kernel(x_ref, w1_ref, b1_ref, w2_ref, b2_ref, w3_ref, b3_ref, o_ref):
    # Fused hot path: three matmuls (f32 accumulation) + f32 bias adds + f32 ReLUs,
    # all resident in VMEM. Intermediates are cast to the weight dtype only at the
    # next matmul input (so the epilogue stays f32 -> no bf16 VPU work on v5e).
    x = x_ref[...]
    h1 = jnp.dot(x, w1_ref[...], preferred_element_type=jnp.float32) + b1_ref[...]
    h1 = jnp.maximum(h1, 0.0)
    h2 = (
        jnp.dot(h1.astype(w2_ref.dtype), w2_ref[...],
                preferred_element_type=jnp.float32)
        + b2_ref[...]
    )
    h2 = jnp.maximum(h2, 0.0)
    out = (
        jnp.dot(h2.astype(w3_ref.dtype), w3_ref[...],
                preferred_element_type=jnp.float32)
        + b3_ref[...]
    )
    o_ref[...] = out.astype(o_ref.dtype)


def _round_up(n, m):
    return ((n + m - 1) // m) * m


def coefficient_learner_forward(x, params, *, tile_m=512, use_bf16=False):
    """x: (batch, seq_len) float32. params: dict of w1,b1,w2,b2,w3,b3.

    tile_m:  batch-tile rows per grid step (multiple of 256 recommended on v6e/v7x;
             halve on v7x for very large seq_len due to its 64 MiB VMEM).
    use_bf16: cast x and the three weight matrices to bf16 for the MXU; accumulation,
             bias add and ReLU stay f32.
    """
    w1, b1, w2, b2, w3, b3 = (
        params["w1"], params["b1"], params["w2"],
        params["b2"], params["w3"], params["b3"],
    )
    batch, seq_len = x.shape
    out_dim = w3.shape[1]  # = 4

    if use_bf16:
        x = x.astype(jnp.bfloat16)
        w1 = w1.astype(jnp.bfloat16)
        w2 = w2.astype(jnp.bfloat16)
        w3 = w3.astype(jnp.bfloat16)
    # biases stay f32: the epilogue runs in f32.

    # Pick a row tile: clamp to the (8-aligned) batch for tiny inputs, otherwise use
    # tile_m. Pad the batch so every grid step sees a full block (no edge masking).
    tm = min(tile_m, _round_up(batch, 8))
    padded_batch = _round_up(batch, tm)
    if padded_batch != batch:
        x = jnp.pad(x, ((0, padded_batch - batch), (0, 0)))
    grid = (padded_batch // tm,)

    # Weights/biases: full-array blocks, constant index_map -> loaded once, resident
    # in VMEM across all batch tiles.
    resident = lambda a: pl.BlockSpec(a.shape, lambda i: (0, 0))

    out = pl.pallas_call(
        _mlp_kernel,
        out_shape=jax.ShapeDtypeStruct((padded_batch, out_dim), jnp.float32),
        grid=grid,
        in_specs=[
            pl.BlockSpec((tm, seq_len), lambda i: (i, 0)),  # x: moving batch tile
            resident(w1), resident(b1),
            resident(w2), resident(b2),
            resident(w3), resident(b3),
        ],
        # TODO(synk): output is lane-width-4 (masked vst); pad to lane-dense only if
        # profiling ever shows the store side exposed -- output bytes are tiny.
        out_specs=pl.BlockSpec((tm, out_dim), lambda i: (i, 0)),
        compiler_params=pltpu.CompilerParams(
            dimension_semantics=("parallel",),  # megacore sharding on v7x
        ),
    )(x, w1, b1, w2, b2, w3, b3)

    return out[:batch]


def init_params(key, seq_len):
    """Deterministic init matching nn.Linear default: U(-1/sqrt(fan_in), 1/sqrt(fan_in))."""
    dims = [(seq_len, 128), (128, 64), (64, 4)]
    params = {}
    for i, (fan_in, fan_out) in enumerate(dims, start=1):
        key, kw, kb = jax.random.split(key, 3)
        bound = 1.0 / (fan_in ** 0.5)
        params[f"w{i}"] = jax.random.uniform(
            kw, (fan_in, fan_out), jnp.float32, minval=-bound, maxval=bound)
        params[f"b{i}"] = jax.random.uniform(
            kb, (1, fan_out), jnp.float32, minval=-bound, maxval=bound)
    return params


def _reference_forward(x, params):
    h1 = jnp.maximum(x @ params["w1"] + params["b1"], 0.0)
    h2 = jnp.maximum(h1 @ params["w2"] + params["b2"], 0.0)
    return h2 @ params["w3"] + params["b3"]


if __name__ == "__main__":
    # --- small demo shapes (single grid step) ---
    seq_len = 8
    batch = 8

    key = jax.random.PRNGKey(0)
    key, kx = jax.random.split(key)
    x = jax.random.normal(kx, (batch, seq_len), dtype=jnp.float32)
    params = init_params(key, seq_len)

    out = coefficient_learner_forward(x, params)
    out = jax.block_until_ready(out)
    ref = _reference_forward(x, params)
    assert out.shape == (batch, 4), out.shape
    assert jnp.allclose(out, ref, atol=1e-5, rtol=1e-5), "f32 mismatch vs reference"

    # --- multi-tile + padding path (grid > 1, batch not a tile multiple) ---
    seq_len2 = 16
    batch2 = 300
    key, kx2 = jax.random.split(key)
    x2 = jax.random.normal(kx2, (batch2, seq_len2), dtype=jnp.float32)
    params2 = init_params(key, seq_len2)

    out2 = coefficient_learner_forward(x2, params2, tile_m=128)
    out2 = jax.block_until_ready(out2)
    ref2 = _reference_forward(x2, params2)
    assert out2.shape == (batch2, 4), out2.shape
    assert jnp.allclose(out2, ref2, atol=1e-5, rtol=1e-5), "tiled f32 mismatch"

    # --- bf16 matmul operands, f32 accumulation/epilogue (loose tolerance vs f32 ref) ---
    out2_bf16 = coefficient_learner_forward(x2, params2, tile_m=128, use_bf16=True)
    out2_bf16 = jax.block_until_ready(out2_bf16)
    assert jnp.allclose(out2_bf16, ref2, atol=5e-2, rtol=5e-2), "bf16 path out of tolerance"

    print("KERNEL_OK")
</pallas_src>

<mosaic_0001>
module attributes {stable_mosaic.version = 11 : i64} {
  func.func @_mlp_kernel(%arg0: i32, %arg1: memref<8x8xf32, #tpu.memory_space<vmem>>, %arg2: memref<8x128xf32, #tpu.memory_space<vmem>>, %arg3: memref<1x128xf32, #tpu.memory_space<vmem>>, %arg4: memref<128x64xf32, #tpu.memory_space<vmem>>, %arg5: memref<1x64xf32, #tpu.memory_space<vmem>>, %arg6: memref<64x4xf32, #tpu.memory_space<vmem>>, %arg7: memref<1x4xf32, #tpu.memory_space<vmem>>, %arg8: memref<8x4xf32, #tpu.memory_space<vmem>>) attributes {dimension_semantics = [#tpu.dimension_semantics<parallel>], iteration_bounds = array<i64: 1>, scalar_prefetch = 0 : i64, scratch_operands = 0 : i64, tpu.core_type = #tpu.core_type<tc>, window_params = [{transform_indices = @transform_0, window_bounds = array<i64: 8, 8>}, {pipeline_mode = #tpu.pipeline_mode<synchronous>, transform_indices = @transform_1, window_bounds = array<i64: 8, 128>}, {pipeline_mode = #tpu.pipeline_mode<synchronous>, transform_indices = @transform_2, window_bounds = array<i64: 1, 128>}, {pipeline_mode = #tpu.pipeline_mode<synchronous>, transform_indices = @transform_3, window_bounds = array<i64: 128, 64>}, {pipeline_mode = #tpu.pipeline_mode<synchronous>, transform_indices = @transform_4, window_bounds = array<i64: 1, 64>}, {pipeline_mode = #tpu.pipeline_mode<synchronous>, transform_indices = @transform_5, window_bounds = array<i64: 64, 4>}, {pipeline_mode = #tpu.pipeline_mode<synchronous>, transform_indices = @transform_6, window_bounds = array<i64: 1, 4>}, {transform_indices = @transform_7, window_bounds = array<i64: 8, 4>}]} {
    %c0 = arith.constant 0 : index
    %c0_0 = arith.constant 0 : index
    %0 = vector.load %arg1[%c0, %c0_0] : memref<8x8xf32, #tpu.memory_space<vmem>>, vector<8x8xf32>
    %c0_1 = arith.constant 0 : index
    %c0_2 = arith.constant 0 : index
    %1 = vector.load %arg2[%c0_1, %c0_2] : memref<8x128xf32, #tpu.memory_space<vmem>>, vector<8x128xf32>
    %cst = arith.constant dense<0.000000e+00> : vector<8x128xf32>
    %2 = tpu.matmul %0, %1, %cst {dimension_numbers = #tpu.dot_dimension_numbers<[1], [0], [0], [1], [0, 0, 1, 1], [], []>} : vector<8x8xf32>, vector<8x128xf32>, vector<8x128xf32> -> vector<8x128xf32>
    %c0_3 = arith.constant 0 : index
    %c0_4 = arith.constant 0 : index
    %3 = vector.load %arg3[%c0_3, %c0_4] : memref<1x128xf32, #tpu.memory_space<vmem>>, vector<1x128xf32>
    %4 = vector.broadcast %3 : vector<1x128xf32> to vector<8x128xf32>
    %5 = arith.addf %2, %4 : vector<8x128xf32>
    %cst_5 = arith.constant 0.000000e+00 : f32
    %6 = vector.broadcast %cst_5 : f32 to vector<8x128xf32>
    %7 = arith.maximumf %5, %6 : vector<8x128xf32>
    %c0_6 = arith.constant 0 : index
    %c0_7 = arith.constant 0 : index
    %8 = vector.load %arg4[%c0_6, %c0_7] : memref<128x64xf32, #tpu.memory_space<vmem>>, vector<128x64xf32>
    %cst_8 = arith.constant dense<0.000000e+00> : vector<8x64xf32>
    %9 = tpu.matmul %7, %8, %cst_8 {dimension_numbers = #tpu.dot_dimension_numbers<[1], [0], [0], [1], [0, 0, 1, 1], [], []>} : vector<8x128xf32>, vector<128x64xf32>, vector<8x64xf32> -> vector<8x64xf32>
    %c0_9 = arith.constant 0 : index
    %c0_10 = arith.constant 0 : index
    %10 = vector.load %arg5[%c0_9, %c0_10] : memref<1x64xf32, #tpu.memory_space<vmem>>, vector<1x64xf32>
    %11 = vector.broadcast %10 : vector<1x64xf32> to vector<8x64xf32>
    %12 = arith.addf %9, %11 : vector<8x64xf32>
    %cst_11 = arith.constant 0.000000e+00 : f32
    %13 = vector.broadcast %cst_11 : f32 to vector<8x64xf32>
    %14 = arith.maximumf %12, %13 : vector<8x64xf32>
    %c0_12 = arith.constant 0 : index
    %c0_13 = arith.constant 0 : index
    %15 = vector.load %arg6[%c0_12, %c0_13] : memref<64x4xf32, #tpu.memory_space<vmem>>, vector<64x4xf32>
    %cst_14 = arith.constant dense<0.000000e+00> : vector<8x4xf32>
    %16 = tpu.matmul %14, %15, %cst_14 {dimension_numbers = #tpu.dot_dimension_numbers<[1], [0], [0], [1], [0, 0, 1, 1], [], []>} : vector<8x64xf32>, vector<64x4xf32>, vector<8x4xf32> -> vector<8x4xf32>
    %c0_15 = arith.constant 0 : index
    %c0_16 = arith.constant 0 : index
    %17 = vector.load %arg7[%c0_15, %c0_16] : memref<1x4xf32, #tpu.memory_space<vmem>>, vector<1x4xf32>
    %18 = vector.broadcast %17 : vector<1x4xf32> to vector<8x4xf32>
    %19 = arith.addf %16, %18 : vector<8x4xf32>
    %c0_17 = arith.constant 0 : index
    %c0_18 = arith.constant 0 : index
    %20 = vector.load %arg8[%c0_17, %c0_18] : memref<8x4xf32, #tpu.memory_space<vmem>>, vector<8x4xf32>
    tpu.vector_store %arg8[%c0_17, %c0_18], %19 {strides = array<i32>} : memref<8x4xf32, #tpu.memory_space<vmem>>, vector<8x4xf32>,
    return
  }
  func.func @transform_0(%arg0: i32) -> (i32, i32) {
    %c0_i32 = arith.constant 0 : i32
    %c0_i32_0 = arith.constant 0 : i32
    return %arg0, %c0_i32 : i32, i32
  }
  func.func @transform_1(%arg0: i32) -> (i32, i32) {
    %c0_i32 = arith.constant 0 : i32
    %c0_i32_0 = arith.constant 0 : i32
    %c0_i32_1 = arith.constant 0 : i32
    return %c0_i32, %c0_i32_0 : i32, i32
  }
  func.func @transform_2(%arg0: i32) -> (i32, i32) {
    %c0_i32 = arith.constant 0 : i32
    %c0_i32_0 = arith.constant 0 : i32
    %c0_i32_1 = arith.constant 0 : i32
    return %c0_i32, %c0_i32_0 : i32, i32
  }
  func.func @transform_3(%arg0: i32) -> (i32, i32) {
    %c0_i32 = arith.constant 0 : i32
    %c0_i32_0 = arith.constant 0 : i32
    %c0_i32_1 = arith.constant 0 : i32
    return %c0_i32, %c0_i32_0 : i32, i32
  }
  func.func @transform_4(%arg0: i32) -> (i32, i32) {
    %c0_i32 = arith.constant 0 : i32
    %c0_i32_0 = arith.constant 0 : i32
    %c0_i32_1 = arith.constant 0 : i32
    return %c0_i32, %c0_i32_0 : i32, i32
  }
  func.func @transform_5(%arg0: i32) -> (i32, i32) {
    %c0_i32 = arith.constant 0 : i32
    %c0_i32_0 = arith.constant 0 : i32
    %c0_i32_1 = arith.constant 0 : i32
    return %c0_i32, %c0_i32_0 : i32, i32
  }
  func.func @transform_6(%arg0: i32) -> (i32, i32) {
    %c0_i32 = arith.constant 0 : i32
    %c0_i32_0 = arith.constant 0 : i32
    %c0_i32_1 = arith.constant 0 : i32
    return %c0_i32, %c0_i32_0 : i32, i32
  }
  func.func @transform_7(%arg0: i32) -> (i32, i32) {
    %c0_i32 = arith.constant 0 : i32
    %c0_i32_0 = arith.constant 0 : i32
    return %arg0, %c0_i32 : i32, i32
  }
}

</mosaic_0001>

<bundles_post_ra>
// kernel: tpu_custom_call.1
= control target key start
LH: loop header
LB: loop body
LE: loop exit
PB: predicated region body
PF: predicated region fallthrough
CT: control target
= control target key end

     0   :  { %vm35_vm0 = vcmask 64512   ;;  %v393_v0 = vmov 0.0   ;;  %vm394_vm1 = vmmov 0   ;;  %vm219_vm2 = vcmask 523264   ;;  %s556_s1 = inlined_call_operand.vmem [shape: f32[8,128], index: 1, kind: input, shape index: {}]   ;;  %s557_s0 = inlined_call_operand.vmem [shape: f32[8,8], index: 0, kind: input, shape index: {}]   ;;  %s558_s3 = inlined_call_operand.vmem [shape: f32[128,64], index: 3, kind: input, shape index: {}]   ;;  %s559_s5 = inlined_call_operand.vmem [shape: f32[64,4], index: 5, kind: input, shape index: {}]   ;;  %s560_s2 = inlined_call_operand.vmem [shape: f32[1,128], index: 2, kind: input, shape index: {}]   ;;  %s561_s4 = inlined_call_operand.vmem [shape: f32[1,64], index: 4, kind: input, shape index: {}]   ;;  %s562_s6 = inlined_call_operand.vmem [shape: f32[1,4], index: 6, kind: input, shape index: {}]   ;;  %s563_s7 = inlined_call_operand.vmem [shape: f32[8,4], index: 7, kind: output, shape index: {}]  }
   0x1   :  { %332 = vmatprep.subr.mxu0 %v393_v0  ;;  %v27_v1 = vld [vmem:[%s556_s1] sm:$0xff]  ;;  %334 = vmatprep.mubr.msk.f32.mxu0 %vm394_vm1, %v393_v0  ;;  %v125_v3 = vld [vmem:[%s558_s3 + $0x78] sm:$0xff]  ;;  %v124_v4 = vld [vmem:[%s558_s3 + $0x70] sm:$0xff]  ;;  %vm293_vm3 = vcmask 31744  }
   0x2   :  { %v26_v2 = vld [vmem:[%s557_s0] sm:$0xff]  ;;  %333 = vmatpush3.msra.mxu0 %v27_v1  ;;  %337 = vmatprep.subr.mxu1 %v393_v0  ;;  %v123_v5 = vld [vmem:[%s558_s3 + $0x68] sm:$0xff]  ;;  %v121_v7 = vld [vmem:[%s558_s3 + $0x58] sm:$0xff] }
   0x3   :  { %335 = vmatmul.mubr.msk.f32.vlgmr.msra.gmra.mxu0 %vm35_vm0, %v26_v2  ;;  %338 = vmatpush3.msra.mxu1 %v125_v3  ;;  %v122_v6 = vld [vmem:[%s558_s3 + $0x60] sm:$0xff]  ;;  %v120_v8 = vld [vmem:[%s558_s3 + $0x50] sm:$0xff]  ;;  %v119_v9 = vld [vmem:[%s558_s3 + $0x48] sm:$0xff] }
   0x4   :  { %339 = vmatprep.subr.mxu1 %v393_v0  ;;  %369 = vmatprep.mubr.msk.f32.mxu1 %vm394_vm1, %v393_v0  ;;  %v118_v10 = vld [vmem:[%s558_s3 + $0x40] sm:$0xff]  ;;  %v117_v11 = vld [vmem:[%s558_s3 + $0x38] sm:$0xff]  ;;  %v116_v12 = vld [vmem:[%s558_s3 + $0x30] sm:$0xff] }
   0x5   :  { %340 = vmatpush3.msra.mxu1 %v124_v4  ;;  %372 = vmatprep.subr.mxu0 %v393_v0  ;;  %v115_v13 = vld [vmem:[%s558_s3 + $0x28] sm:$0xff]  ;;  %v114_v14 = vld [vmem:[%s558_s3 + $0x20] sm:$0xff]  ;;  %v113_v15 = vld [vmem:[%s558_s3 + $0x18] sm:$0xff] }
   0x6   :  { %341 = vmatprep.subr.mxu1 %v393_v0  ;;  %388 = vmatprep.mubr.msk.f32.mxu0 %vm394_vm1, %v393_v0  ;;  %v112_v16 = vld [vmem:[%s558_s3 + $0x10] sm:$0xff]  ;;  %v111_v17 = vld [vmem:[%s558_s3 + $0x8] sm:$0xff]  ;;  %v110_v18 = vld [vmem:[%s558_s3] sm:$0xff] }
   0x7   :  { %342 = vmatpush3.msra.mxu1 %v123_v5  ;;  %v211_v19 = vld [vmem:[%s559_s5 + $0x38] sm:$0xff]  ;;  %v210_v20 = vld [vmem:[%s559_s5 + $0x30] sm:$0xff]  ;;  %v209_v21 = vld [vmem:[%s559_s5 + $0x28] sm:$0xff] }
   0x8   :  { %343 = vmatprep.subr.mxu1 %v393_v0  ;;  %373 = vmatpush3.msra.mxu0 %v211_v19  ;;  %v208_v22 = vld [vmem:[%s559_s5 + $0x20] sm:$0xff]  ;;  %v207_v23 = vld [vmem:[%s559_s5 + $0x18] sm:$0xff]  ;;  %v206_v29 = vld [vmem:[%s559_s5 + $0x10] sm:$0xff] }
   0x9   :  { %344 = vmatpush3.msra.mxu1 %v122_v6  ;;  %374 = vmatprep.subr.mxu0 %v393_v0  ;;  %v299_v24 = vld [vmem:[%s560_s2] ss:$0 sm:$0xff]  ;;  %v205_v30 = vld [vmem:[%s559_s5 + $0x8] sm:$0xff] }
   0xa   :  { %345 = vmatprep.subr.mxu1 %v393_v0  ;;  %375 = vmatpush3.msra.mxu0 %v210_v20  ;;  %v204_v31 = vld [vmem:[%s559_s5] sm:$0xff] }
   0xb   :  { %346 = vmatpush3.msra.mxu1 %v121_v7  ;;  %376 = vmatprep.subr.mxu0 %v393_v0  ;;  %v301_v32 = vld [vmem:[%s561_s4] ss:$0 sm:$0xff] }
   0xc   :  { %347 = vmatprep.subr.mxu1 %v393_v0  ;;  %377 = vmatpush3.msra.mxu0 %v209_v21  ;;  %v302_v37 = vld [vmem:[%s562_s6] ss:$0 sm:$0xff] }
   0xd   :  { %348 = vmatpush3.msra.mxu1 %v120_v8  ;;  %378 = vmatprep.subr.mxu0 %v393_v0 }
   0xe   :  { %349 = vmatprep.subr.mxu1 %v393_v0  ;;  %379 = vmatpush3.msra.mxu0 %v208_v22 }
   0xf   :  { %350 = vmatpush3.msra.mxu1 %v119_v9  ;;  %380 = vmatprep.subr.mxu0 %v393_v0 }
  0x10   :  { %351 = vmatprep.subr.mxu1 %v393_v0  ;;  %381 = vmatpush3.msra.mxu0 %v207_v23 }
  0x11   :  { %352 = vmatpush3.msra.mxu1 %v118_v10  ;;  %382 = vmatprep.subr.mxu0 %v393_v0 }
  0x12   :  { %353 = vmatprep.subr.mxu1 %v393_v0  ;;  %383 = vmatpush3.msra.mxu0 %v206_v29 }
  0x13   :  { %354 = vmatpush3.msra.mxu1 %v117_v11  ;;  %384 = vmatprep.subr.mxu0 %v393_v0 }
  0x14   :  { %355 = vmatprep.subr.mxu1 %v393_v0  ;;  %385 = vmatpush3.msra.mxu0 %v205_v30 }
  0x15   :  { %356 = vmatpush3.msra.mxu1 %v116_v12  ;;  %386 = vmatprep.subr.mxu0 %v393_v0 }
  0x16   :  { %357 = vmatprep.subr.mxu1 %v393_v0  ;;  %387 = vmatpush3.msra.mxu0 %v204_v31 }
  0x17   :  { %358 = vmatpush3.msra.mxu1 %v115_v13 }
  0x18   :  { %359 = vmatprep.subr.mxu1 %v393_v0 }
  0x19   :  { %360 = vmatpush3.msra.mxu1 %v114_v14 }
  0x1a   :  { %361 = vmatprep.subr.mxu1 %v393_v0 }
  0x1b   :  { %362 = vmatpush3.msra.mxu1 %v113_v15 }
  0x1c   :  { %363 = vmatprep.subr.mxu1 %v393_v0 }
  0x1d   :  { %364 = vmatpush3.msra.mxu1 %v112_v16 }
  0x1e   :  { %365 = vmatprep.subr.mxu1 %v393_v0 }
  0x1f   :  { %366 = vmatpush3.msra.mxu1 %v111_v17 }
  0x20   :  { %367 = vmatprep.subr.mxu1 %v393_v0 }
  0x21   :  { %368 = vmatpush3.msra.mxu1 %v110_v18 }
  0xc3   :  { %v105_v25 = vpop.f32.mrf.mxu0 }
  0xc4   :  { %v106_v26 = vadd.f32 %v299_v24, %v105_v25 }
  0xc5   :  { %v336_v27 = vpop.f32.mrf.mxu0 }
  0xc6   :  { %v109_v28 = vmax.f32 %v106_v26, 0.0 }
  0xc8   :  { %370 = vmatmul.mubr.f32.vlgmr.msra.gmra.mxu1 %v109_v28 }
 0x188   :  { %v199_v33 = vpop.f32.mrf.mxu1 }
 0x189   :  { %v200_v34 = vadd.f32 %v301_v32, %v199_v33 }
 0x18a   :  { %v371_v35 = vpop.f32.mrf.mxu1 }
 0x18b   :  { %v203_v36 = vmax.f32 %v200_v34, 0.0 }
 0x18d   :  { %389 = vmatmul.mubr.msk.f32.vlgmr.msra.gmra.mxu0 %vm219_vm2, %v203_v36 }
 0x24d   :  { %v289_v38 = vpop.f32.mrf.mxu0 }
 0x24e   :  { %v290_v39 = vadd.f32 %v302_v37, %v289_v38 }
 0x24f   :  { %v390_v40 = vpop.f32.mrf.mxu0 }
 0x250   :  { %294 = vst.msk [vmem:[%s563_s7] sm:$0xff] %vm293_vm3, %v290_v39 }

</bundles_post_ra>
